<compile_context>
chip_gen: v6e
topology: v6e:2x2x1
jax: 0.10.0
libtpu: 0.0.40
codegen_flags: <defaults>
</compile_context>

<pallas_src>
import functools

import jax
import jax.numpy as jnp
from jax.experimental import pallas as pl
from jax.experimental.pallas import tpu as pltpu

LANE = 128      # TPU lane width (last-dim tile)
SUBLANE = 8     # f32 sublane width (second-to-last-dim tile)

# Activation map mirroring Readout.ACT_MAP (PyTorch defaults: LeakyReLU slope=0.01, ELU alpha=1.0)
ACT_MAP = {
    "relu": lambda x: jnp.maximum(x, 0.0),
    "tanh": jnp.tanh,
    "sigmoid": jax.nn.sigmoid,
    "leaky_relu": lambda x: jnp.where(x >= 0, x, 0.01 * x),
    "elu": lambda x: jnp.where(x > 0, x, jnp.expm1(x)),
}
_TRANSCENDENTAL_ACTS = ("tanh", "sigmoid", "elu")


def _round_up(x, m):
    return (x + m - 1) // m * m


def _pad2d(a, rows, cols):
    r, c = a.shape
    return jnp.pad(a, ((0, rows - r), (0, cols - c)))


def _make_readout_kernel(num_fc, act, compute_dtype):
    """Fused MLP-readout kernel.

    Ref order:
      x [TB, G+ND]  (concat of graph features and RAW demographics),
      w1 [G+ND, D1p], b1 [1, D1p]   (Linear(1,F) encoder + concat already folded in),
      (w, b) pairs for fc layers 2..num_fc and the final linear,
      out [TB, out_channels]        (out_channels NOT lane-padded; lane-dense hidden dims only).
    """

    def kernel(x_ref, w1_ref, b1_ref, *rest):
        out_ref = rest[-1]
        wb = rest[:-1]   # flat (w, b) pairs

        # ---- Layer 1: single fused matmul; AlphaDropout(eval) == identity ----
        h = act(jnp.dot(x_ref[...], w1_ref[...], preferred_element_type=jnp.float32)
                + b1_ref[...]).astype(compute_dtype)

        # ---- Hidden fc layers 2..num_fc (Linear + act + identity-dropout) ----
        idx = 0
        for _ in range(1, num_fc):
            w_ref, b_ref = wb[idx], wb[idx + 1]
            idx += 2
            h = act(jnp.dot(h, w_ref[...], preferred_element_type=jnp.float32)
                    + b_ref[...]).astype(compute_dtype)

        # ---- Final Linear(fc_dim[-1], out_channels); narrow lane-count store (cheap vs. padded HBM writeback) ----
        w_ref, b_ref = wb[idx], wb[idx + 1]
        out_ref[...] = (jnp.dot(h, w_ref[...], preferred_element_type=jnp.float32)
                        + b_ref[...]).astype(out_ref.dtype)

    return kernel


def init_readout_params(key, graph_dim, feature_output_dim, which_layer, fc_dim, out_channels):
    """Deterministic synthetic parameters (stand-in for the module's nn.Linear params).

    Linear weights stored transposed vs PyTorch ([in_features, out_features]); biases [1, out].
    Demographic weight rows in layer 1 are laid out in `which_layer` order (sex, mutation, age)."""
    num_demo = len([f for f in which_layer if f in ("sex", "mutation", "age")])
    fc_input_dim = graph_dim + num_demo * feature_output_dim

    keys = jax.random.split(key, 2 * (len(fc_dim) + 2))
    ki = iter(range(len(keys)))

    def linear(in_dim, out_dim):
        kw, kb = keys[next(ki)], keys[next(ki)]
        scale = 1.0 / jnp.sqrt(jnp.float32(in_dim))
        w = jax.random.uniform(kw, (in_dim, out_dim), jnp.float32, -scale, scale)
        b = jax.random.uniform(kb, (1, out_dim), jnp.float32, -scale, scale)
        return w, b

    enc_w, enc_b = linear(1, feature_output_dim)  # feature_encoder = Linear(1, F)

    layers = []
    d_in = fc_input_dim
    for d_out in fc_dim:
        layers.append(linear(d_in, d_out))
        d_in = d_out
    layers.append(linear(d_in, out_channels))     # final Linear(fc_dim[-1], out_channels)

    return {"encoder": (enc_w, enc_b), "layers": layers, "num_demo": num_demo}


def prepare_readout_params(params, graph_dim, use_bf16=False):
    """One-time (out of the per-call hot path) parameter prep.

    * Fold the Linear(1, F) encoder + concat into layer 1:
        enc_k @ W1d_k == demo_k @ (ew @ W1d_k) + eb @ W1d_k
      and stack the folded demographic rows under the graph rows, so layer 1 is one matmul
      over concat([graph, sex, mutation, age]).
    * Zero-pad hidden output dims to the 128-lane width. NOTE: padded activation columns
      may be non-zero after the activation (e.g. sigmoid(0)=0.5); correctness relies on the
      padded K-rows of the NEXT layer's weight being exactly zero (jnp.pad default) — keep it so.
    * out_channels is left UNPADDED (the padded HBM writeback would dominate traffic).
    * use_bf16: hidden/final weights cast to bf16; layer-1 weight and all biases stay f32 so
      un-normalized demographics (age) keep full precision; accumulation stays f32 in-kernel.
    """
    enc_w, enc_b = params["encoder"]
    layers = params["layers"]
    num_demo = params["num_demo"]
    F = enc_w.shape[1]
    G = graph_dim

    w1, b1 = layers[0]                               # [G + ND*F, D1], [1, D1]
    d1 = w1.shape[1]
    w1_graph = w1[:G, :]                             # [G, D1]
    w1_demo = w1[G:, :].reshape(num_demo, F, d1)     # [ND, F, D1]
    wd = jnp.einsum("f,kfd->kd", enc_w[0], w1_demo)                    # [ND, D1]
    b1_eff = b1 + jnp.einsum("f,kfd->d", enc_b[0], w1_demo)[None, :]   # [1, D1]

    d1p = _round_up(d1, LANE)
    w1_fused = _pad2d(jnp.concatenate([w1_graph, wd], axis=0), G + num_demo, d1p)  # [G+ND, D1p]
    b1_p = _pad2d(b1_eff, 1, d1p)

    wdt = jnp.bfloat16 if use_bf16 else jnp.float32
    padded_layers = []
    prev_p = d1p
    for w, b in layers[1:-1]:                        # fc layers 2..num_fc
        doutp = _round_up(w.shape[1], LANE)
        padded_layers.append((_pad2d(w, prev_p, doutp).astype(wdt), _pad2d(b, 1, doutp)))
        prev_p = doutp
    wf, bf_ = layers[-1]                             # final Linear: out dim NOT padded
    padded_layers.append((_pad2d(wf, prev_p, wf.shape[1]).astype(wdt), bf_))

    return {"w1": w1_fused, "b1": b1_p, "layers": padded_layers}


@functools.partial(jax.jit, static_argnames=("fc_act", "tb"))
def readout_forward(graph_features, demo_feats, prepped, fc_act="relu", tb=512):
    """Fused readout forward (eval mode). `prepped` comes from prepare_readout_params.

    demo_feats: tuple of [B, 1] arrays in the same order used when building the params
    (which_layer order: sex, mutation, age)."""
    w1, b1 = prepped["w1"], prepped["b1"]
    layers = prepped["layers"]
    num_fc = len(layers)                         # == len(fc_dim)
    out_channels = layers[-1][0].shape[1]
    d1p = w1.shape[1]
    act = ACT_MAP[fc_act]
    compute_dtype = layers[0][0].dtype           # bf16 if prepared with use_bf16, else f32

    B, _ = graph_features.shape
    # Single layer-1 input: concat([graph, raw demographics]); encoder is folded into w1.
    # Kept f32 even in the bf16 path so age ([20, 80], un-normalized) keeps full precision.
    x = jnp.concatenate((graph_features,) + tuple(demo_feats), axis=1).astype(jnp.float32)
    K1 = x.shape[1]

    # Batch tile: large default (512) amortizes ~0.35 us/grid step and fills the 256-wide MXU
    # on v6e/v7x. For large batches, cap TB so there are >= 2 grid steps — ("parallel",)
    # shards the batch grid across v7x's two TensorCores.
    TB = min(tb, _round_up(B, SUBLANE))
    if B >= 256 and _round_up(B, TB) == TB:      # would collapse to a single grid step
        TB = _round_up((B + 1) // 2, SUBLANE)
    Bp = _round_up(B, TB)
    x_p = jnp.pad(x, ((0, Bp - B), (0, 0)))

    const = lambda i: (0, 0)
    inputs = [x_p, w1, b1]
    in_specs = [
        pl.BlockSpec((TB, K1), lambda i: (i, 0)),
        pl.BlockSpec(w1.shape, const),
        pl.BlockSpec(b1.shape, const),
    ]
    for w, b in layers:
        inputs += [w, b]
        in_specs += [pl.BlockSpec(w.shape, const), pl.BlockSpec(b.shape, const)]

    # Explicit VMEM budget (conservative: double-buffer everything + activation temporaries),
    # capped well under v7x's 64 MiB physical VMEM.
    weight_bytes = sum(int(a.size) * a.dtype.itemsize for a in inputs[1:])
    tile_bytes = TB * K1 * 4 + TB * out_channels * 4
    est = 2 * (weight_bytes + tile_bytes) + 8 * TB * d1p * 4
    vmem_limit = int(min(max(2 * est, 16 << 20), 48 << 20))

    # Advisory cost estimate for the XLA scheduler (transcendentals for EUP-bound activations).
    flops = 2 * Bp * K1 * d1p
    kdim = d1p
    for w, _ in layers:
        flops += 2 * Bp * kdim * w.shape[1]
        kdim = w.shape[1]
    if fc_act in _TRANSCENDENTAL_ACTS:
        hid_dims = [d1p] + [w.shape[1] for w, _ in layers[:-1]]
        transcendentals = Bp * sum(hid_dims)
    else:
        transcendentals = 0
    bytes_accessed = Bp * K1 * 4 + weight_bytes + Bp * out_channels * 4

    kernel = _make_readout_kernel(num_fc, act, compute_dtype)

    out = pl.pallas_call(
        kernel,
        out_shape=jax.ShapeDtypeStruct((Bp, out_channels), jnp.float32),
        grid=(Bp // TB,),
        in_specs=in_specs,
        out_specs=pl.BlockSpec((TB, out_channels), lambda i: (i, 0)),
        compiler_params=pltpu.CompilerParams(
            dimension_semantics=("parallel",),
            vmem_limit_bytes=vmem_limit,
        ),
        cost_estimate=pl.CostEstimate(
            flops=int(flops), transcendentals=int(transcendentals),
            bytes_accessed=int(bytes_accessed)),
    )(*inputs)

    return out[:B]                                # only batch-padding rows to drop


def reference_forward(graph_features, demo_feats, params, fc_act="relu"):
    """Pure-JAX reference mirroring the PyTorch forward (eval mode)."""
    enc_w, enc_b = params["encoder"]
    encoded = [d @ enc_w + enc_b for d in demo_feats]            # encode_features
    total = jnp.concatenate([graph_features] + list(encoded), axis=1)  # concatenate_features
    act = ACT_MAP[fc_act]
    h = total
    for w, b in params["layers"][:-1]:
        h = act(h @ w + b)                                       # Linear + act + AlphaDropout(eval)
    w, b = params["layers"][-1]
    return h @ w + b                                             # final Linear


if __name__ == "__main__":
    # Small config consistent with the module's __init__:
    B = 8                      # batch (graphs)
    graph_dim = 32             # pooled graph-feature dim
    feature_output_dim = 8     # feature_encoder output dim (F)
    which_layer = ["sex", "mutation", "age"]
    fc_dim = [64, 32]
    out_channels = 4
    # fc_input_dim = graph_dim + 3 * feature_output_dim = 56

    key = jax.random.PRNGKey(0)
    k_p, k_g, k_s, k_m, k_a = jax.random.split(key, 5)

    params = init_readout_params(
        k_p, graph_dim, feature_output_dim, which_layer, fc_dim, out_channels
    )
    prepped_f32 = prepare_readout_params(params, graph_dim, use_bf16=False)
    prepped_bf16 = prepare_readout_params(params, graph_dim, use_bf16=True)

    graph_features = jax.random.normal(k_g, (B, graph_dim), jnp.float32)
    sex = jax.random.bernoulli(k_s, 0.5, (B, 1)).astype(jnp.float32)
    mutation = jax.random.bernoulli(k_m, 0.3, (B, 1)).astype(jnp.float32)
    age = jax.random.uniform(k_a, (B, 1), jnp.float32, 20.0, 80.0)
    demo_feats = (sex, mutation, age)  # batch.sex, batch.mutation, batch.age (which_layer order)

    # --- fp32 path, relu ---
    out = jax.block_until_ready(
        readout_forward(graph_features, demo_feats, prepped_f32, fc_act="relu"))
    ref = reference_forward(graph_features, demo_feats, params, fc_act="relu")
    assert out.shape == (B, out_channels), out.shape
    assert jnp.allclose(out, ref, rtol=1e-3, atol=1e-3), (
        "mismatch", float(jnp.max(jnp.abs(out - ref))))

    # --- fp32 path, elu, batch not a multiple of the tile (exercises grid + batch padding) ---
    B2 = 20
    kg2, ks2, km2, ka2 = jax.random.split(jax.random.PRNGKey(1), 4)
    gf2 = jax.random.normal(kg2, (B2, graph_dim), jnp.float32)
    demo2 = (jax.random.bernoulli(ks2, 0.5, (B2, 1)).astype(jnp.float32),
             jax.random.bernoulli(km2, 0.3, (B2, 1)).astype(jnp.float32),
             jax.random.uniform(ka2, (B2, 1), jnp.float32, 20.0, 80.0))
    out2 = jax.block_until_ready(
        readout_forward(gf2, demo2, prepped_f32, fc_act="elu", tb=8))
    ref2 = reference_forward(gf2, demo2, params, fc_act="elu")
    assert out2.shape == (B2, out_channels), out2.shape
    assert jnp.allclose(out2, ref2, rtol=1e-3, atol=1e-3), (
        "mismatch (elu/grid)", float(jnp.max(jnp.abs(out2 - ref2))))

    # --- fp32 path, sigmoid, larger batch (exercises the >=2-grid-step split for v7x and the
    #     sigmoid(0)=0.5 padded-column inertness) ---
    B3 = 272
    kg3, ks3, km3, ka3 = jax.random.split(jax.random.PRNGKey(2), 4)
    gf3 = jax.random.normal(kg3, (B3, graph_dim), jnp.float32)
    demo3 = (jax.random.bernoulli(ks3, 0.5, (B3, 1)).astype(jnp.float32),
             jax.random.bernoulli(km3, 0.3, (B3, 1)).astype(jnp.float32),
             jax.random.uniform(ka3, (B3, 1), jnp.float32, 20.0, 80.0))
    out3 = jax.block_until_ready(
        readout_forward(gf3, demo3, prepped_f32, fc_act="sigmoid"))
    ref3 = reference_forward(gf3, demo3, params, fc_act="sigmoid")
    assert out3.shape == (B3, out_channels), out3.shape
    assert jnp.allclose(out3, ref3, rtol=1e-3, atol=1e-3), (
        "mismatch (sigmoid/split)", float(jnp.max(jnp.abs(out3 - ref3))))

    # --- bf16 matmul-operand path (v6e/v7x MXU); layer 1 + biases + accumulation stay f32 ---
    out_bf = jax.block_until_ready(
        readout_forward(graph_features, demo_feats, prepped_bf16, fc_act="relu"))
    assert out_bf.shape == (B, out_channels), out_bf.shape
    assert bool(jnp.isfinite(out_bf).all())
    rel = float(jnp.max(jnp.abs(out_bf - ref)) / (jnp.max(jnp.abs(ref)) + 1e-6))
    assert rel < 0.1, ("bf16 drift too large", rel)

    print("KERNEL_OK")
</pallas_src>

<mosaic_0001>
module attributes {stable_mosaic.version = 11 : i64} {
  func.func @kernel(%arg0: i32, %arg1: memref<8x35xf32, #tpu.memory_space<vmem>>, %arg2: memref<35x128xf32, #tpu.memory_space<vmem>>, %arg3: memref<1x128xf32, #tpu.memory_space<vmem>>, %arg4: memref<128x128xf32, #tpu.memory_space<vmem>>, %arg5: memref<1x128xf32, #tpu.memory_space<vmem>>, %arg6: memref<128x4xf32, #tpu.memory_space<vmem>>, %arg7: memref<1x4xf32, #tpu.memory_space<vmem>>, %arg8: memref<8x4xf32, #tpu.memory_space<vmem>>) attributes {dimension_semantics = [#tpu.dimension_semantics<parallel>], iteration_bounds = array<i64: 1>, scalar_prefetch = 0 : i64, scratch_operands = 0 : i64, tpu.core_type = #tpu.core_type<tc>, window_params = [{transform_indices = @transform_0, window_bounds = array<i64: 8, 35>}, {pipeline_mode = #tpu.pipeline_mode<synchronous>, transform_indices = @transform_1, window_bounds = array<i64: 35, 128>}, {pipeline_mode = #tpu.pipeline_mode<synchronous>, transform_indices = @transform_2, window_bounds = array<i64: 1, 128>}, {pipeline_mode = #tpu.pipeline_mode<synchronous>, transform_indices = @transform_3, window_bounds = array<i64: 128, 128>}, {pipeline_mode = #tpu.pipeline_mode<synchronous>, transform_indices = @transform_4, window_bounds = array<i64: 1, 128>}, {pipeline_mode = #tpu.pipeline_mode<synchronous>, transform_indices = @transform_5, window_bounds = array<i64: 128, 4>}, {pipeline_mode = #tpu.pipeline_mode<synchronous>, transform_indices = @transform_6, window_bounds = array<i64: 1, 4>}, {transform_indices = @transform_7, window_bounds = array<i64: 8, 4>}]} {
    %c0 = arith.constant 0 : index
    %c0_0 = arith.constant 0 : index
    %0 = vector.load %arg1[%c0, %c0_0] : memref<8x35xf32, #tpu.memory_space<vmem>>, vector<8x35xf32>
    %c0_1 = arith.constant 0 : index
    %c0_2 = arith.constant 0 : index
    %1 = vector.load %arg2[%c0_1, %c0_2] : memref<35x128xf32, #tpu.memory_space<vmem>>, vector<35x128xf32>
    %cst = arith.constant dense<0.000000e+00> : vector<8x128xf32>
    %2 = tpu.matmul %0, %1, %cst {dimension_numbers = #tpu.dot_dimension_numbers<[1], [0], [0], [1], [0, 0, 1, 1], [], []>} : vector<8x35xf32>, vector<35x128xf32>, vector<8x128xf32> -> vector<8x128xf32>
    %c0_3 = arith.constant 0 : index
    %c0_4 = arith.constant 0 : index
    %3 = vector.load %arg3[%c0_3, %c0_4] : memref<1x128xf32, #tpu.memory_space<vmem>>, vector<1x128xf32>
    %4 = vector.broadcast %3 : vector<1x128xf32> to vector<8x128xf32>
    %5 = arith.addf %2, %4 : vector<8x128xf32>
    %cst_5 = arith.constant 0.000000e+00 : f32
    %6 = vector.broadcast %cst_5 : f32 to vector<8x128xf32>
    %7 = arith.maximumf %5, %6 : vector<8x128xf32>
    %c0_6 = arith.constant 0 : index
    %c0_7 = arith.constant 0 : index
    %8 = vector.load %arg4[%c0_6, %c0_7] : memref<128x128xf32, #tpu.memory_space<vmem>>, vector<128x128xf32>
    %cst_8 = arith.constant dense<0.000000e+00> : vector<8x128xf32>
    %9 = tpu.matmul %7, %8, %cst_8 {dimension_numbers = #tpu.dot_dimension_numbers<[1], [0], [0], [1], [0, 0, 1, 1], [], []>} : vector<8x128xf32>, vector<128x128xf32>, vector<8x128xf32> -> vector<8x128xf32>
    %c0_9 = arith.constant 0 : index
    %c0_10 = arith.constant 0 : index
    %10 = vector.load %arg5[%c0_9, %c0_10] : memref<1x128xf32, #tpu.memory_space<vmem>>, vector<1x128xf32>
    %11 = vector.broadcast %10 : vector<1x128xf32> to vector<8x128xf32>
    %12 = arith.addf %9, %11 : vector<8x128xf32>
    %cst_11 = arith.constant 0.000000e+00 : f32
    %13 = vector.broadcast %cst_11 : f32 to vector<8x128xf32>
    %14 = arith.maximumf %12, %13 : vector<8x128xf32>
    %c0_12 = arith.constant 0 : index
    %c0_13 = arith.constant 0 : index
    %15 = vector.load %arg6[%c0_12, %c0_13] : memref<128x4xf32, #tpu.memory_space<vmem>>, vector<128x4xf32>
    %cst_14 = arith.constant dense<0.000000e+00> : vector<8x4xf32>
    %16 = tpu.matmul %14, %15, %cst_14 {dimension_numbers = #tpu.dot_dimension_numbers<[1], [0], [0], [1], [0, 0, 1, 1], [], []>} : vector<8x128xf32>, vector<128x4xf32>, vector<8x4xf32> -> vector<8x4xf32>
    %c0_15 = arith.constant 0 : index
    %c0_16 = arith.constant 0 : index
    %17 = vector.load %arg7[%c0_15, %c0_16] : memref<1x4xf32, #tpu.memory_space<vmem>>, vector<1x4xf32>
    %18 = vector.broadcast %17 : vector<1x4xf32> to vector<8x4xf32>
    %19 = arith.addf %16, %18 : vector<8x4xf32>
    %c0_17 = arith.constant 0 : index
    %c0_18 = arith.constant 0 : index
    %20 = vector.load %arg8[%c0_17, %c0_18] : memref<8x4xf32, #tpu.memory_space<vmem>>, vector<8x4xf32>
    tpu.vector_store %arg8[%c0_17, %c0_18], %19 {strides = array<i32>} : memref<8x4xf32, #tpu.memory_space<vmem>>, vector<8x4xf32>,
    return
  }
  func.func @transform_0(%arg0: i32) -> (i32, i32) {
    %c0_i32 = arith.constant 0 : i32
    %c0_i32_0 = arith.constant 0 : i32
    return %arg0, %c0_i32 : i32, i32
  }
  func.func @transform_1(%arg0: i32) -> (i32, i32) {
    %c0_i32 = arith.constant 0 : i32
    %c0_i32_0 = arith.constant 0 : i32
    %c0_i32_1 = arith.constant 0 : i32
    return %c0_i32, %c0_i32_0 : i32, i32
  }
  func.func @transform_2(%arg0: i32) -> (i32, i32) {
    %c0_i32 = arith.constant 0 : i32
    %c0_i32_0 = arith.constant 0 : i32
    %c0_i32_1 = arith.constant 0 : i32
    return %c0_i32, %c0_i32_0 : i32, i32
  }
  func.func @transform_3(%arg0: i32) -> (i32, i32) {
    %c0_i32 = arith.constant 0 : i32
    %c0_i32_0 = arith.constant 0 : i32
    %c0_i32_1 = arith.constant 0 : i32
    return %c0_i32, %c0_i32_0 : i32, i32
  }
  func.func @transform_4(%arg0: i32) -> (i32, i32) {
    %c0_i32 = arith.constant 0 : i32
    %c0_i32_0 = arith.constant 0 : i32
    %c0_i32_1 = arith.constant 0 : i32
    return %c0_i32, %c0_i32_0 : i32, i32
  }
  func.func @transform_5(%arg0: i32) -> (i32, i32) {
    %c0_i32 = arith.constant 0 : i32
    %c0_i32_0 = arith.constant 0 : i32
    %c0_i32_1 = arith.constant 0 : i32
    return %c0_i32, %c0_i32_0 : i32, i32
  }
  func.func @transform_6(%arg0: i32) -> (i32, i32) {
    %c0_i32 = arith.constant 0 : i32
    %c0_i32_0 = arith.constant 0 : i32
    %c0_i32_1 = arith.constant 0 : i32
    return %c0_i32, %c0_i32_0 : i32, i32
  }
  func.func @transform_7(%arg0: i32) -> (i32, i32) {
    %c0_i32 = arith.constant 0 : i32
    %c0_i32_0 = arith.constant 0 : i32
    return %arg0, %c0_i32 : i32, i32
  }
}

</mosaic_0001>

<bundles_post_ra>
// kernel: readout_forward.1
= control target key start
LH: loop header
LB: loop body
LE: loop exit
PB: predicated region body
PF: predicated region fallthrough
CT: control target
= control target key end

     0   :  { %vm43_vm0 = vcmask 1042432   ;;  %v441_v0 = vmov 0.0   ;;  %vm442_vm1 = vmmov 0   ;;  %vm39_vm2 = vcmask 285696   ;;  %s652_s1 = inlined_call_operand.vmem [shape: f32[35,128], index: 1, kind: input, shape index: {}]   ;;  %s653_s3 = inlined_call_operand.vmem [shape: f32[128,128], index: 3, kind: input, shape index: {}]   ;;  %s654_s0 = inlined_call_operand.vmem [shape: f32[8,35], index: 0, kind: input, shape index: {}]   ;;  %s655_s5 = inlined_call_operand.vmem [shape: f32[128,4], index: 5, kind: input, shape index: {}]   ;;  %s656_s2 = inlined_call_operand.vmem [shape: f32[1,128], index: 2, kind: input, shape index: {}]   ;;  %s657_s4 = inlined_call_operand.vmem [shape: f32[1,128], index: 4, kind: input, shape index: {}]   ;;  %s658_s6 = inlined_call_operand.vmem [shape: f32[1,4], index: 6, kind: input, shape index: {}]   ;;  %s659_s7 = inlined_call_operand.vmem [shape: f32[8,4], index: 7, kind: output, shape index: {}]  }
   0x1   :  { %356 = vmatprep.subr.mxu0 %v441_v0  ;;  %v31_v1 = vld [vmem:[%s652_s1 + $0x20] sm:$0x7]  ;;  %v30_v2 = vld [vmem:[%s652_s1 + $0x18] sm:$0xff]  ;;  %366 = vmatprep.mubr.msk.f32.mxu0 %vm442_vm1, %v441_v0  ;;  %v29_v3 = vld [vmem:[%s652_s1 + $0x10] sm:$0xff]  ;;  %vm305_vm3 = vcmask 31744  }
   0x2   :  { %357 = vmatpush3.msk.msra.mxu0 %vm43_vm0, %v31_v1  ;;  %369 = vmatprep.subr.mxu1 %v441_v0  ;;  %v133_v4 = vld [vmem:[%s653_s3 + $0x78] sm:$0xff]  ;;  %v132_v5 = vld [vmem:[%s653_s3 + $0x70] sm:$0xff]  ;;  %v28_v6 = vld [vmem:[%s652_s1 + $0x8] sm:$0xff] }
   0x3   :  { %358 = vmatprep.subr.mxu0 %v441_v0  ;;  %401 = vmatprep.mubr.msk.f32.mxu1 %vm442_vm1, %v441_v0  ;;  %v131_v7 = vld [vmem:[%s653_s3 + $0x68] sm:$0xff]  ;;  %v27_v8 = vld [vmem:[%s652_s1] sm:$0xff]  ;;  %v129_v11 = vld [vmem:[%s653_s3 + $0x58] sm:$0xff] }
   0x4   :  { %359 = vmatpush3.msra.mxu0 %v30_v2  ;;  %370 = vmatpush3.msra.mxu1 %v133_v4  ;;  %v130_v9 = vld [vmem:[%s653_s3 + $0x60] sm:$0xff]  ;;  %v128_v12 = vld [vmem:[%s653_s3 + $0x50] sm:$0xff]  ;;  %v127_v13 = vld [vmem:[%s653_s3 + $0x48] sm:$0xff] }
   0x5   :  { %360 = vmatprep.subr.mxu0 %v441_v0  ;;  %371 = vmatprep.subr.mxu1 %v441_v0  ;;  %v26_v10 = vld [vmem:[%s654_s0] sm:$0xff]  ;;  %v125_v15 = vld [vmem:[%s653_s3 + $0x38] sm:$0xff]  ;;  %v124_v16 = vld [vmem:[%s653_s3 + $0x30] sm:$0xff] }
   0x6   :  { %361 = vmatpush3.msra.mxu0 %v29_v3  ;;  %372 = vmatpush3.msra.mxu1 %v132_v5  ;;  %v126_v14 = vld [vmem:[%s653_s3 + $0x40] sm:$0xff]  ;;  %v123_v17 = vld [vmem:[%s653_s3 + $0x28] sm:$0xff]  ;;  %v121_v19 = vld [vmem:[%s653_s3 + $0x18] sm:$0xff] }
   0x7   :  { %362 = vmatprep.subr.mxu0 %v441_v0  ;;  %373 = vmatprep.subr.mxu1 %v441_v0  ;;  %v122_v18 = vld [vmem:[%s653_s3 + $0x20] sm:$0xff]  ;;  %v120_v20 = vld [vmem:[%s653_s3 + $0x10] sm:$0xff]  ;;  %v119_v21 = vld [vmem:[%s653_s3 + $0x8] sm:$0xff] }
   0x8   :  { %363 = vmatpush3.msra.mxu0 %v28_v6  ;;  %374 = vmatpush3.msra.mxu1 %v131_v7  ;;  %v118_v22 = vld [vmem:[%s653_s3] sm:$0xff]  ;;  %v227_v23 = vld [vmem:[%s655_s5 + $0x78] sm:$0xff]  ;;  %v226_v24 = vld [vmem:[%s655_s5 + $0x70] sm:$0xff] }
   0x9   :  { %364 = vmatprep.subr.mxu0 %v441_v0  ;;  %375 = vmatprep.subr.mxu1 %v441_v0  ;;  %v225_v25 = vld [vmem:[%s655_s5 + $0x68] sm:$0xff]  ;;  %v224_v26 = vld [vmem:[%s655_s5 + $0x60] sm:$0xff]  ;;  %v223_v27 = vld [vmem:[%s655_s5 + $0x58] sm:$0xff] }
   0xa   :  { %365 = vmatpush3.msra.mxu0 %v27_v8  ;;  %376 = vmatpush3.msra.mxu1 %v130_v9  ;;  %v222_v28 = vld [vmem:[%s655_s5 + $0x50] sm:$0xff]  ;;  %v221_v29 = vld [vmem:[%s655_s5 + $0x48] sm:$0xff]  ;;  %v220_v30 = vld [vmem:[%s655_s5 + $0x40] sm:$0xff] }
   0xb   :  { %367 = vmatmul.mubr.msk.f32.vlgmr.msra.gmra.mxu0 %vm39_vm2, %v26_v10  ;;  %377 = vmatprep.subr.mxu1 %v441_v0  ;;  %v219_v31 = vld [vmem:[%s655_s5 + $0x38] sm:$0xff]  ;;  %v218_v32 = vld [vmem:[%s655_s5 + $0x30] sm:$0xff]  ;;  %v217_v33 = vld [vmem:[%s655_s5 + $0x28] sm:$0xff] }
   0xc   :  { %378 = vmatpush3.msra.mxu1 %v129_v11  ;;  %404 = vmatprep.subr.mxu0 %v441_v0  ;;  %v216_v34 = vld [vmem:[%s655_s5 + $0x20] sm:$0xff]  ;;  %v215_v35 = vld [vmem:[%s655_s5 + $0x18] sm:$0xff]  ;;  %v214_v41 = vld [vmem:[%s655_s5 + $0x10] sm:$0xff] }
   0xd   :  { %379 = vmatprep.subr.mxu1 %v441_v0  ;;  %436 = vmatprep.mubr.msk.f32.mxu0 %vm442_vm1, %v441_v0  ;;  %v311_v36 = vld [vmem:[%s656_s2] ss:$0 sm:$0xff]  ;;  %v213_v42 = vld [vmem:[%s655_s5 + $0x8] sm:$0xff] }
   0xe   :  { %380 = vmatpush3.msra.mxu1 %v128_v12  ;;  %405 = vmatpush3.msra.mxu0 %v227_v23  ;;  %v212_v43 = vld [vmem:[%s655_s5] sm:$0xff] }
   0xf   :  { %381 = vmatprep.subr.mxu1 %v441_v0  ;;  %406 = vmatprep.subr.mxu0 %v441_v0  ;;  %v314_v44 = vld [vmem:[%s657_s4] ss:$0 sm:$0xff] }
  0x10   :  { %382 = vmatpush3.msra.mxu1 %v127_v13  ;;  %407 = vmatpush3.msra.mxu0 %v226_v24  ;;  %v315_v49 = vld [vmem:[%s658_s6] ss:$0 sm:$0xff] }
  0x11   :  { %383 = vmatprep.subr.mxu1 %v441_v0  ;;  %408 = vmatprep.subr.mxu0 %v441_v0 }
  0x12   :  { %384 = vmatpush3.msra.mxu1 %v126_v14  ;;  %409 = vmatpush3.msra.mxu0 %v225_v25 }
  0x13   :  { %385 = vmatprep.subr.mxu1 %v441_v0  ;;  %410 = vmatprep.subr.mxu0 %v441_v0 }
  0x14   :  { %386 = vmatpush3.msra.mxu1 %v125_v15  ;;  %411 = vmatpush3.msra.mxu0 %v224_v26 }
  0x15   :  { %387 = vmatprep.subr.mxu1 %v441_v0  ;;  %412 = vmatprep.subr.mxu0 %v441_v0 }
  0x16   :  { %388 = vmatpush3.msra.mxu1 %v124_v16  ;;  %413 = vmatpush3.msra.mxu0 %v223_v27 }
  0x17   :  { %389 = vmatprep.subr.mxu1 %v441_v0  ;;  %414 = vmatprep.subr.mxu0 %v441_v0 }
  0x18   :  { %390 = vmatpush3.msra.mxu1 %v123_v17  ;;  %415 = vmatpush3.msra.mxu0 %v222_v28 }
  0x19   :  { %391 = vmatprep.subr.mxu1 %v441_v0  ;;  %416 = vmatprep.subr.mxu0 %v441_v0 }
  0x1a   :  { %392 = vmatpush3.msra.mxu1 %v122_v18  ;;  %417 = vmatpush3.msra.mxu0 %v221_v29 }
  0x1b   :  { %393 = vmatprep.subr.mxu1 %v441_v0  ;;  %418 = vmatprep.subr.mxu0 %v441_v0 }
  0x1c   :  { %394 = vmatpush3.msra.mxu1 %v121_v19  ;;  %419 = vmatpush3.msra.mxu0 %v220_v30 }
  0x1d   :  { %395 = vmatprep.subr.mxu1 %v441_v0  ;;  %420 = vmatprep.subr.mxu0 %v441_v0 }
  0x1e   :  { %396 = vmatpush3.msra.mxu1 %v120_v20  ;;  %421 = vmatpush3.msra.mxu0 %v219_v31 }
  0x1f   :  { %397 = vmatprep.subr.mxu1 %v441_v0  ;;  %422 = vmatprep.subr.mxu0 %v441_v0 }
  0x20   :  { %398 = vmatpush3.msra.mxu1 %v119_v21  ;;  %423 = vmatpush3.msra.mxu0 %v218_v32 }
  0x21   :  { %399 = vmatprep.subr.mxu1 %v441_v0  ;;  %424 = vmatprep.subr.mxu0 %v441_v0 }
  0x22   :  { %400 = vmatpush3.msra.mxu1 %v118_v22  ;;  %425 = vmatpush3.msra.mxu0 %v217_v33 }
  0x23   :  { %426 = vmatprep.subr.mxu0 %v441_v0 }
  0x24   :  { %427 = vmatpush3.msra.mxu0 %v216_v34 }
  0x25   :  { %428 = vmatprep.subr.mxu0 %v441_v0 }
  0x26   :  { %429 = vmatpush3.msra.mxu0 %v215_v35 }
  0x27   :  { %430 = vmatprep.subr.mxu0 %v441_v0 }
  0x28   :  { %431 = vmatpush3.msra.mxu0 %v214_v41 }
  0x29   :  { %432 = vmatprep.subr.mxu0 %v441_v0 }
  0x2a   :  { %433 = vmatpush3.msra.mxu0 %v213_v42 }
  0x2b   :  { %434 = vmatprep.subr.mxu0 %v441_v0 }
  0x2c   :  { %435 = vmatpush3.msra.mxu0 %v212_v43 }
  0xcb   :  { %v113_v37 = vpop.f32.mrf.mxu0 }
  0xcc   :  { %v114_v38 = vadd.f32 %v311_v36, %v113_v37 }
  0xcd   :  { %v368_v39 = vpop.f32.mrf.mxu0 }
  0xce   :  { %v117_v40 = vmax.f32 %v114_v38, 0.0 }
  0xd0   :  { %402 = vmatmul.mubr.f32.vlgmr.msra.gmra.mxu1 %v117_v40 }
 0x190   :  { %v207_v45 = vpop.f32.mrf.mxu1 }
 0x191   :  { %v208_v46 = vadd.f32 %v314_v44, %v207_v45 }
 0x192   :  { %v403_v47 = vpop.f32.mrf.mxu1 }
 0x193   :  { %v211_v48 = vmax.f32 %v208_v46, 0.0 }
 0x195   :  { %437 = vmatmul.mubr.f32.vlgmr.msra.gmra.mxu0 %v211_v48 }
 0x255   :  { %v301_v50 = vpop.f32.mrf.mxu0 }
 0x256   :  { %v302_v51 = vadd.f32 %v315_v49, %v301_v50 }
 0x257   :  { %v438_v52 = vpop.f32.mrf.mxu0 }
 0x258   :  { %306 = vst.msk [vmem:[%s659_s7] sm:$0xff] %vm305_vm3, %v302_v51 }

</bundles_post_ra>
